<compile_context>
chip_gen: v7x
topology: tpu7x:2x2x1
jax: 0.10.0
libtpu: 0.0.40
codegen_flags: <defaults>
</compile_context>

<pallas_src>
import functools

import jax
import jax.numpy as jnp
from jax.experimental import pallas as pl
from jax.experimental.pallas import tpu as pltpu

SELU_ALPHA = 1.6732632423543772848170429916717
SELU_SCALE = 1.0507009873554804934193349852946
BN_EPS = 0.001
CLAMP_MAX = 10000000.0
VAR_EPS = 0.0001


def _selu(x):
    return SELU_SCALE * jnp.where(x > 0, x, SELU_ALPHA * (jnp.exp(x) - 1.0))


def encoder_kernel(
    x_ref,        # [TILE_B, n_features]      raw counts (batch-tiled)
    b1d_ref,      # [TILE_B, nn_layer1]       per-row bias (b1 + onehot@W1b, BN1-folded)
    eps_ref,      # [TILE_B, latent_dim]      gaussian noise for rsample
    w1_ref,       # [n_features, nn_layer1]   bf16, BN1-folded
    w2_ref,       # [nn_layer1, nn_layer2]    bf16, BN2-folded
    b2_ref,       # [1, nn_layer2]            f32, BN2-folded
    wh_ref,       # [nn_layer2, 2*latent]     bf16, [wm | wv] fused heads
    bh_ref,       # [1, 2*latent]             f32, [bm | bv]
    out_ref,      # [TILE_B, 3*latent]        [z | means | var]
    *,
    latent_dim,
):
    # input_matrix = (input_matrix + 1).log2()      (f32 elementwise)
    x = jnp.log2(x_ref[...] + 1.0)

    # fc1 (BN1 + one-hot contribution already folded into w1 / b1_dyn), SELU.
    h = (
        jnp.dot(x.astype(jnp.bfloat16), w1_ref[...],
                preferred_element_type=jnp.float32)
        + b1d_ref[...]
    )
    h = _selu(h)

    # fc2 (BN2 folded), SELU, clamp(max=1e7).  Dropouts are identity.
    h = (
        jnp.dot(h.astype(jnp.bfloat16), w2_ref[...],
                preferred_element_type=jnp.float32)
        + b2_ref[...]
    )
    h = _selu(h)
    h = jnp.minimum(h, CLAMP_MAX)

    # fused heads: one matmul producing [means | log_vars]
    mv = (
        jnp.dot(h.astype(jnp.bfloat16), wh_ref[...],
                preferred_element_type=jnp.float32)
        + bh_ref[...]
    )
    means = mv[:, :latent_dim]
    log_vars = mv[:, latent_dim:]

    # reparametrize: var = exp(log_vars) + 1e-4 ; sampling = means + sqrt(var)*eps
    var = jnp.exp(log_vars) + VAR_EPS
    sampling = means + jnp.sqrt(var) * eps_ref[...]

    # z_transformation = softmax(dim=-1)  (approx reciprocal -> EUP slot)
    m = jnp.max(sampling, axis=-1, keepdims=True)
    e = jnp.exp(sampling - m)
    z = e * pl.reciprocal(jnp.sum(e, axis=-1, keepdims=True), approx=True)

    # single lane-denser output slab: [z | means | var]
    out_ref[...] = jnp.concatenate([z, means, var], axis=-1)


def fold_params(raw):
    """Fold eval-mode BN into the linears, split fc1's one-hot rows, fuse heads."""
    s1 = raw["gamma1"] / jnp.sqrt(raw["rvar1"] + BN_EPS)
    t1 = raw["beta1"] - raw["rmean1"] * s1
    s2 = raw["gamma2"] / jnp.sqrt(raw["rvar2"] + BN_EPS)
    t2 = raw["beta2"] - raw["rmean2"] * s2

    n_features = raw["n_features"]
    w1_full = raw["w1"]                      # [n_features + n_batch, nn_layer1]
    w1a = w1_full[:n_features] * s1          # acts on log2(x+1)
    w1b = w1_full[n_features:] * s1          # acts on one-hot -> row-select
    b1 = raw["b1"] * s1 + t1

    w2 = raw["w2"] * s2
    b2 = raw["b2"] * s2 + t2

    wh = jnp.concatenate([raw["wm"], raw["wv"]], axis=1)   # [nn2, 2*latent]
    bh = jnp.concatenate([raw["bm"], raw["bv"]], axis=1)   # [1, 2*latent]

    return dict(
        w1=w1a.astype(jnp.bfloat16),   # bf16 MXU operand
        w1b=w1b,                       # f32, used in the XLA wrapper only
        b1=b1,                         # f32
        w2=w2.astype(jnp.bfloat16),
        b2=b2,
        wh=wh.astype(jnp.bfloat16),
        bh=bh,
    )


def encoder_forward(input_matrix, batch_id_onehot, eff, eps, *, tile_b=128):
    B, n_features = input_matrix.shape
    nn1 = eff["w1"].shape[1]
    nn2 = eff["w2"].shape[1]
    latent_dim = eff["bh"].shape[1] // 2

    # onehot @ W1b is a row-select; fold it into a per-row bias on the XLA side.
    b1_dyn = jnp.dot(batch_id_onehot, eff["w1b"]) + eff["b1"]   # [B, nn1], f32

    # batch tile: multiple of 8 (sublane), never larger than the padded batch.
    tile_b = max(8, (int(tile_b) // 8) * 8)
    tile_b = min(tile_b, ((B + 7) // 8) * 8)
    bp = pl.cdiv(B, tile_b) * tile_b
    if bp != B:
        pad = bp - B
        input_matrix = jnp.pad(input_matrix, ((0, pad), (0, 0)))
        b1_dyn = jnp.pad(b1_dyn, ((0, pad), (0, 0)))
        eps = jnp.pad(eps, ((0, pad), (0, 0)))

    grid = (bp // tile_b,)

    in_specs = [
        pl.BlockSpec((tile_b, n_features), lambda i: (i, 0)),       # x
        pl.BlockSpec((tile_b, nn1), lambda i: (i, 0)),               # b1_dyn
        pl.BlockSpec((tile_b, latent_dim), lambda i: (i, 0)),        # eps
        pl.BlockSpec((n_features, nn1), lambda i: (0, 0)),           # w1 (resident)
        pl.BlockSpec((nn1, nn2), lambda i: (0, 0)),                  # w2 (resident)
        pl.BlockSpec((1, nn2), lambda i: (0, 0)),                    # b2
        pl.BlockSpec((nn2, 2 * latent_dim), lambda i: (0, 0)),       # wh (fused heads)
        pl.BlockSpec((1, 2 * latent_dim), lambda i: (0, 0)),         # bh
    ]
    out_spec = pl.BlockSpec((tile_b, 3 * latent_dim), lambda i: (i, 0))
    out_shape = jax.ShapeDtypeStruct((bp, 3 * latent_dim), jnp.float32)

    kernel = functools.partial(encoder_kernel, latent_dim=latent_dim)

    # TODO(synk): for very large n_features add a K (feature) grid axis with a
    # VMEM f32 accumulator (P3) so the W1 slab never exceeds v7x's 64 MiB VMEM.
    out = pl.pallas_call(
        kernel,
        grid=grid,
        in_specs=in_specs,
        out_specs=out_spec,
        out_shape=out_shape,
        compiler_params=pltpu.CompilerParams(
            dimension_semantics=("parallel",),     # shards batch across TCs on v7x
            vmem_limit_bytes=32 * 1024 * 1024,     # safe on v5e/v6e/v7x
        ),
    )(input_matrix, b1_dyn, eps,
      eff["w1"], eff["w2"], eff["b2"], eff["wh"], eff["bh"])

    z = out[:B, :latent_dim]
    means = out[:B, latent_dim:2 * latent_dim]
    var = out[:B, 2 * latent_dim:]
    return z, means, var


def make_params(key, n_features, n_batch, nn_layer1, nn_layer2, latent_dim):
    """Deterministic synthetic raw parameters (shapes match the torch module)."""
    ks = jax.random.split(key, 16)

    def lin(kw, kb, n_in, n_out):
        # torch nn.Linear default init: U(-1/sqrt(fan_in), 1/sqrt(fan_in))
        bound = 1.0 / jnp.sqrt(jnp.float32(n_in))
        w = jax.random.uniform(kw, (n_in, n_out), jnp.float32, -bound, bound)
        b = jax.random.uniform(kb, (1, n_out), jnp.float32, -bound, bound)
        return w, b

    w1, b1 = lin(ks[0], ks[1], n_features + n_batch, nn_layer1)
    w2, b2 = lin(ks[2], ks[3], nn_layer1, nn_layer2)
    wm, bm = lin(ks[4], ks[5], nn_layer2, latent_dim)
    wv, bv = lin(ks[6], ks[7], nn_layer2, latent_dim)

    def bn_raw(kg, kb2, km, kv, n):
        gamma = 1.0 + 0.1 * jax.random.normal(kg, (1, n), jnp.float32)
        beta = 0.1 * jax.random.normal(kb2, (1, n), jnp.float32)
        rmean = 0.05 * jax.random.normal(km, (1, n), jnp.float32)
        rvar = 1.0 + 0.1 * jax.random.uniform(kv, (1, n), jnp.float32)
        return gamma, beta, rmean, rvar

    g1, be1, rm1, rv1 = bn_raw(ks[8], ks[9], ks[10], ks[11], nn_layer1)
    g2, be2, rm2, rv2 = bn_raw(ks[12], ks[13], ks[14], ks[15], nn_layer2)

    return dict(
        n_features=n_features,
        w1=w1, b1=b1, w2=w2, b2=b2, wm=wm, bm=bm, wv=wv, bv=bv,
        gamma1=g1, beta1=be1, rmean1=rm1, rvar1=rv1,
        gamma2=g2, beta2=be2, rmean2=rm2, rvar2=rv2,
    )


def encoder_reference(x, onehot, raw, eps):
    """Pure-JAX f32 reference with the unfused (raw) parameters."""
    s1 = raw["gamma1"] / jnp.sqrt(raw["rvar1"] + BN_EPS)
    t1 = raw["beta1"] - raw["rmean1"] * s1
    s2 = raw["gamma2"] / jnp.sqrt(raw["rvar2"] + BN_EPS)
    t2 = raw["beta2"] - raw["rmean2"] * s2

    xl = jnp.log2(x + 1.0)
    h = jnp.concatenate([xl, onehot], axis=1) @ raw["w1"] + raw["b1"]
    h = _selu(h * s1 + t1)
    h = (h @ raw["w2"] + raw["b2"]) * s2 + t2
    h = jnp.minimum(_selu(h), CLAMP_MAX)
    means = h @ raw["wm"] + raw["bm"]
    log_vars = h @ raw["wv"] + raw["bv"]
    var = jnp.exp(log_vars) + VAR_EPS
    sampling = means + jnp.sqrt(var) * eps
    z = jax.nn.softmax(sampling, axis=-1)
    return z, means, var


if __name__ == "__main__":
    # small, module-consistent shapes; TILE_B=8 with B=16 -> grid=(2,)
    B, n_features, n_batch = 16, 16, 4
    nn_layer1, nn_layer2, latent_dim = 32, 32, 8
    TILE_B = 8

    key = jax.random.PRNGKey(0)
    k_x, k_id, k_eps, k_p = jax.random.split(key, 4)

    # non-negative "count" features
    input_matrix = jnp.round(
        20.0 * jax.random.uniform(k_x, (B, n_features), jnp.float32)
    )
    batch_ids = jax.random.randint(k_id, (B,), 0, n_batch)
    batch_id_onehot = jax.nn.one_hot(batch_ids, n_batch, dtype=jnp.float32)
    eps = jax.random.normal(k_eps, (B, latent_dim), jnp.float32)

    raw = make_params(k_p, n_features, n_batch, nn_layer1, nn_layer2, latent_dim)
    eff = fold_params(raw)

    z, means, var = encoder_forward(
        input_matrix, batch_id_onehot, eff, eps, tile_b=TILE_B
    )
    jax.block_until_ready((z, means, var))

    z_ref, means_ref, var_ref = encoder_reference(
        input_matrix, batch_id_onehot, raw, eps
    )

    assert z.shape == (B, latent_dim)
    assert means.shape == (B, latent_dim)
    assert var.shape == (B, latent_dim)
    assert bool(jnp.all(jnp.isfinite(z)))
    assert bool(jnp.all(jnp.isfinite(means)))
    assert bool(jnp.all(jnp.isfinite(var)))
    # softmax rows sum to ~1 (approx reciprocal -> ~1e-3 tolerance)
    assert jnp.allclose(jnp.sum(z, axis=-1), 1.0, atol=5e-3)
    # tolerance vs the f32 reference covers bf16 weights + approx reciprocal
    assert jnp.allclose(means, means_ref, atol=1e-1, rtol=1e-1)
    assert jnp.allclose(var, var_ref, atol=1e-1, rtol=2e-1)
    assert jnp.allclose(z, z_ref, atol=5e-2)

    print("KERNEL_OK")
</pallas_src>

<mosaic_0001>
module attributes {stable_mosaic.version = 11 : i64} {
  func.func @encoder_kernel(%arg0: i32, %arg1: memref<8x16xf32, #tpu.memory_space<vmem>>, %arg2: memref<8x32xf32, #tpu.memory_space<vmem>>, %arg3: memref<8x8xf32, #tpu.memory_space<vmem>>, %arg4: memref<16x32xbf16, #tpu.memory_space<vmem>>, %arg5: memref<32x32xbf16, #tpu.memory_space<vmem>>, %arg6: memref<1x32xf32, #tpu.memory_space<vmem>>, %arg7: memref<32x16xbf16, #tpu.memory_space<vmem>>, %arg8: memref<1x16xf32, #tpu.memory_space<vmem>>, %arg9: memref<8x24xf32, #tpu.memory_space<vmem>>) attributes {dimension_semantics = [#tpu.dimension_semantics<parallel>], iteration_bounds = array<i64: 2>, scalar_prefetch = 0 : i64, scratch_operands = 0 : i64, tpu.core_type = #tpu.core_type<tc>, window_params = [{transform_indices = @transform_0, window_bounds = array<i64: 8, 16>}, {transform_indices = @transform_1, window_bounds = array<i64: 8, 32>}, {transform_indices = @transform_2, window_bounds = array<i64: 8, 8>}, {pipeline_mode = #tpu.pipeline_mode<synchronous>, transform_indices = @transform_3, window_bounds = array<i64: 16, 32>}, {pipeline_mode = #tpu.pipeline_mode<synchronous>, transform_indices = @transform_4, window_bounds = array<i64: 32, 32>}, {pipeline_mode = #tpu.pipeline_mode<synchronous>, transform_indices = @transform_5, window_bounds = array<i64: 1, 32>}, {pipeline_mode = #tpu.pipeline_mode<synchronous>, transform_indices = @transform_6, window_bounds = array<i64: 32, 16>}, {pipeline_mode = #tpu.pipeline_mode<synchronous>, transform_indices = @transform_7, window_bounds = array<i64: 1, 16>}, {transform_indices = @transform_8, window_bounds = array<i64: 8, 24>}]} {
    %c0 = arith.constant 0 : index
    %c0_0 = arith.constant 0 : index
    %0 = vector.load %arg1[%c0, %c0_0] : memref<8x16xf32, #tpu.memory_space<vmem>>, vector<8x16xf32>
    %cst = arith.constant 1.000000e+00 : f32
    %1 = vector.broadcast %cst : f32 to vector<8x16xf32>
    %2 = arith.addf %0, %1 : vector<8x16xf32>
    %3 = math.log %2 : vector<8x16xf32>
    %cst_1 = arith.constant 2.000000e+00 : f32
    %4 = math.log %cst_1 : f32
    %5 = vector.broadcast %4 : f32 to vector<8x16xf32>
    %6 = arith.divf %3, %5 : vector<8x16xf32>
    %7 = arith.truncf %6 : vector<8x16xf32> to vector<8x16xbf16>
    %c0_2 = arith.constant 0 : index
    %c0_3 = arith.constant 0 : index
    %8 = vector.load %arg4[%c0_2, %c0_3] : memref<16x32xbf16, #tpu.memory_space<vmem>>, vector<16x32xbf16>
    %cst_4 = arith.constant dense<0.000000e+00> : vector<8x32xf32>
    %9 = tpu.matmul %7, %8, %cst_4 {dimension_numbers = #tpu.dot_dimension_numbers<[1], [0], [0], [1], [0, 0, 1, 1], [], []>} : vector<8x16xbf16>, vector<16x32xbf16>, vector<8x32xf32> -> vector<8x32xf32>
    %c0_5 = arith.constant 0 : index
    %c0_6 = arith.constant 0 : index
    %10 = vector.load %arg2[%c0_5, %c0_6] : memref<8x32xf32, #tpu.memory_space<vmem>>, vector<8x32xf32>
    %11 = arith.addf %9, %10 : vector<8x32xf32>
    %cst_7 = arith.constant 0.000000e+00 : f32
    %12 = vector.broadcast %cst_7 : f32 to vector<8x32xf32>
    %13 = arith.cmpf ogt, %11, %12 : vector<8x32xf32>
    %14 = math.exp %11 : vector<8x32xf32>
    %cst_8 = arith.constant 1.000000e+00 : f32
    %15 = vector.broadcast %cst_8 : f32 to vector<8x32xf32>
    %16 = arith.subf %14, %15 : vector<8x32xf32>
    %cst_9 = arith.constant 1.67326319 : f32
    %17 = vector.broadcast %cst_9 : f32 to vector<8x32xf32>
    %18 = arith.mulf %17, %16 : vector<8x32xf32>
    %19 = arith.select %13, %11, %18 : vector<8x32xi1>, vector<8x32xf32>
    %cst_10 = arith.constant 1.05070102 : f32
    %20 = vector.broadcast %cst_10 : f32 to vector<8x32xf32>
    %21 = arith.mulf %20, %19 : vector<8x32xf32>
    %22 = arith.truncf %21 : vector<8x32xf32> to vector<8x32xbf16>
    %c0_11 = arith.constant 0 : index
    %c0_12 = arith.constant 0 : index
    %23 = vector.load %arg5[%c0_11, %c0_12] : memref<32x32xbf16, #tpu.memory_space<vmem>>, vector<32x32xbf16>
    %cst_13 = arith.constant dense<0.000000e+00> : vector<8x32xf32>
    %24 = tpu.matmul %22, %23, %cst_13 {dimension_numbers = #tpu.dot_dimension_numbers<[1], [0], [0], [1], [0, 0, 1, 1], [], []>} : vector<8x32xbf16>, vector<32x32xbf16>, vector<8x32xf32> -> vector<8x32xf32>
    %c0_14 = arith.constant 0 : index
    %c0_15 = arith.constant 0 : index
    %25 = vector.load %arg6[%c0_14, %c0_15] : memref<1x32xf32, #tpu.memory_space<vmem>>, vector<1x32xf32>
    %26 = vector.broadcast %25 : vector<1x32xf32> to vector<8x32xf32>
    %27 = arith.addf %24, %26 : vector<8x32xf32>
    %cst_16 = arith.constant 0.000000e+00 : f32
    %28 = vector.broadcast %cst_16 : f32 to vector<8x32xf32>
    %29 = arith.cmpf ogt, %27, %28 : vector<8x32xf32>
    %30 = math.exp %27 : vector<8x32xf32>
    %cst_17 = arith.constant 1.000000e+00 : f32
    %31 = vector.broadcast %cst_17 : f32 to vector<8x32xf32>
    %32 = arith.subf %30, %31 : vector<8x32xf32>
    %cst_18 = arith.constant 1.67326319 : f32
    %33 = vector.broadcast %cst_18 : f32 to vector<8x32xf32>
    %34 = arith.mulf %33, %32 : vector<8x32xf32>
    %35 = arith.select %29, %27, %34 : vector<8x32xi1>, vector<8x32xf32>
    %cst_19 = arith.constant 1.05070102 : f32
    %36 = vector.broadcast %cst_19 : f32 to vector<8x32xf32>
    %37 = arith.mulf %36, %35 : vector<8x32xf32>
    %cst_20 = arith.constant 1.000000e+07 : f32
    %38 = vector.broadcast %cst_20 : f32 to vector<8x32xf32>
    %39 = arith.minimumf %37, %38 : vector<8x32xf32>
    %40 = arith.truncf %39 : vector<8x32xf32> to vector<8x32xbf16>
    %c0_21 = arith.constant 0 : index
    %c0_22 = arith.constant 0 : index
    %41 = vector.load %arg7[%c0_21, %c0_22] : memref<32x16xbf16, #tpu.memory_space<vmem>>, vector<32x16xbf16>
    %cst_23 = arith.constant dense<0.000000e+00> : vector<8x16xf32>
    %42 = tpu.matmul %40, %41, %cst_23 {dimension_numbers = #tpu.dot_dimension_numbers<[1], [0], [0], [1], [0, 0, 1, 1], [], []>} : vector<8x32xbf16>, vector<32x16xbf16>, vector<8x16xf32> -> vector<8x16xf32>
    %c0_24 = arith.constant 0 : index
    %c0_25 = arith.constant 0 : index
    %43 = vector.load %arg8[%c0_24, %c0_25] : memref<1x16xf32, #tpu.memory_space<vmem>>, vector<1x16xf32>
    %44 = vector.broadcast %43 : vector<1x16xf32> to vector<8x16xf32>
    %45 = arith.addf %42, %44 : vector<8x16xf32>
    %46 = vector.extract_strided_slice %45 {offsets = [0, 0], sizes = [8, 8], strides = [1, 1]} : vector<8x16xf32> to vector<8x8xf32>
    %47 = vector.extract_strided_slice %45 {offsets = [0, 8], sizes = [8, 8], strides = [1, 1]} : vector<8x16xf32> to vector<8x8xf32>
    %48 = math.exp %47 : vector<8x8xf32>
    %cst_26 = arith.constant 9.99999974E-5 : f32
    %49 = vector.broadcast %cst_26 : f32 to vector<8x8xf32>
    %50 = arith.addf %48, %49 : vector<8x8xf32>
    %51 = math.sqrt %50 : vector<8x8xf32>
    %c0_27 = arith.constant 0 : index
    %c0_28 = arith.constant 0 : index
    %52 = vector.load %arg3[%c0_27, %c0_28] : memref<8x8xf32, #tpu.memory_space<vmem>>, vector<8x8xf32>
    %53 = arith.mulf %51, %52 : vector<8x8xf32>
    %54 = arith.addf %46, %53 : vector<8x8xf32>
    %cst_29 = arith.constant dense<0xFF800000> : vector<8xf32>
    %55 = vector.multi_reduction <maximumf>, %54, %cst_29 [1] : vector<8x8xf32> to vector<8xf32>
    %56 = vector.shape_cast %55 : vector<8xf32> to vector<8x1xf32>
    %57 = vector.broadcast %56 : vector<8x1xf32> to vector<8x8xf32>
    %58 = arith.subf %54, %57 : vector<8x8xf32>
    %59 = math.exp %58 : vector<8x8xf32>
    %cst_30 = arith.constant dense<0.000000e+00> : vector<8xf32>
    %60 = vector.multi_reduction <add>, %59, %cst_30 [1] : vector<8x8xf32> to vector<8xf32>
    %61 = vector.shape_cast %60 : vector<8xf32> to vector<8x1xf32>
    %62 = tpu.reciprocal %61 {approx = true} : vector<8x1xf32> -> vector<8x1xf32>
    %63 = vector.broadcast %62 : vector<8x1xf32> to vector<8x8xf32>
    %64 = arith.mulf %59, %63 : vector<8x8xf32>
    %65 = tpu.concatenate %64, %46, %50 in 1 : vector<8x8xf32>, vector<8x8xf32>, vector<8x8xf32> -> vector<8x24xf32>
    %c0_31 = arith.constant 0 : index
    %c0_32 = arith.constant 0 : index
    %66 = vector.load %arg9[%c0_31, %c0_32] : memref<8x24xf32, #tpu.memory_space<vmem>>, vector<8x24xf32>
    tpu.vector_store %arg9[%c0_31, %c0_32], %65 {strides = array<i32>} : memref<8x24xf32, #tpu.memory_space<vmem>>, vector<8x24xf32>,
    return
  }
  func.func @transform_0(%arg0: i32) -> (i32, i32) {
    %c0_i32 = arith.constant 0 : i32
    %c0_i32_0 = arith.constant 0 : i32
    return %arg0, %c0_i32 : i32, i32
  }
  func.func @transform_1(%arg0: i32) -> (i32, i32) {
    %c0_i32 = arith.constant 0 : i32
    %c0_i32_0 = arith.constant 0 : i32
    return %arg0, %c0_i32 : i32, i32
  }
  func.func @transform_2(%arg0: i32) -> (i32, i32) {
    %c0_i32 = arith.constant 0 : i32
    %c0_i32_0 = arith.constant 0 : i32
    return %arg0, %c0_i32 : i32, i32
  }
  func.func @transform_3(%arg0: i32) -> (i32, i32) {
    %c0_i32 = arith.constant 0 : i32
    %c0_i32_0 = arith.constant 0 : i32
    %c0_i32_1 = arith.constant 0 : i32
    return %c0_i32, %c0_i32_0 : i32, i32
  }
  func.func @transform_4(%arg0: i32) -> (i32, i32) {
    %c0_i32 = arith.constant 0 : i32
    %c0_i32_0 = arith.constant 0 : i32
    %c0_i32_1 = arith.constant 0 : i32
    return %c0_i32, %c0_i32_0 : i32, i32
  }
  func.func @transform_5(%arg0: i32) -> (i32, i32) {
    %c0_i32 = arith.constant 0 : i32
    %c0_i32_0 = arith.constant 0 : i32
    %c0_i32_1 = arith.constant 0 : i32
    return %c0_i32, %c0_i32_0 : i32, i32
  }
  func.func @transform_6(%arg0: i32) -> (i32, i32) {
    %c0_i32 = arith.constant 0 : i32
    %c0_i32_0 = arith.constant 0 : i32
    %c0_i32_1 = arith.constant 0 : i32
    return %c0_i32, %c0_i32_0 : i32, i32
  }
  func.func @transform_7(%arg0: i32) -> (i32, i32) {
    %c0_i32 = arith.constant 0 : i32
    %c0_i32_0 = arith.constant 0 : i32
    %c0_i32_1 = arith.constant 0 : i32
    return %c0_i32, %c0_i32_0 : i32, i32
  }
  func.func @transform_8(%arg0: i32) -> (i32, i32) {
    %c0_i32 = arith.constant 0 : i32
    %c0_i32_0 = arith.constant 0 : i32
    return %arg0, %c0_i32 : i32, i32
  }
}

</mosaic_0001>

<bundles_post_ra>
// kernel: tpu_custom_call.1
= control target key start
LH: loop header
LB: loop body
LE: loop exit
PB: predicated region body
PF: predicated region fallthrough
CT: control target
= control target key end

     0   :  { %13 = vsyncpa [#allocation3], 0  ;;  %s1172_s0 = inlined_call_operand.vmem [shape: f32[16,16], index: 0, kind: input, shape index: {}]   ;;  %s1173_s1 = inlined_call_operand.vmem [shape: f32[16,32], index: 1, kind: input, shape index: {}]   ;;  %s1174_s2 = inlined_call_operand.vmem [shape: f32[16,8], index: 2, kind: input, shape index: {}]   ;;  %s1175_s3 = inlined_call_operand.hbm [shape: bf16[16,32], index: 3, kind: input, shape index: {}]   ;;  %s1176_s4 = inlined_call_operand.vmem [shape: bf16[32,32], index: 4, kind: input, shape index: {}]   ;;  %s1177_s5 = inlined_call_operand.vmem [shape: f32[1,32], index: 5, kind: input, shape index: {}]   ;;  %s1178_s6 = inlined_call_operand.vmem [shape: bf16[32,16], index: 6, kind: input, shape index: {}]   ;;  %s1179_s7 = inlined_call_operand.vmem [shape: f32[1,16], index: 7, kind: input, shape index: {}]   ;;  %s1180_s8 = inlined_call_operand.hbm [shape: f32[16,24], index: 8, kind: output, shape index: {}]  }
   0x1   :  { %14 = vsyncpa [#allocation4], 0 }
   0x2   :  { %16 = vsyncpa [#allocation4 + $0x1], 0  ;;  %s995_s27 = smov 0   ;;  %s997_s28 = smov 0  }
   0x3   :  { %s999_s29 = smov 0   ;;  %s1001_s30 = smov 0  }
   0x4 LB: > { %s1016_s9 = sadd.s32 4294967295, %s940_s30   ;;  %s715_s10 = sadd.s32 4294967294, %s940_s30   ;;  %s940_s30 = sphi %s1001_s30, %s1196_s30   ;;  %s936_s29 = sphi %s999_s29, %s1195_s29   ;;  %s932_s28 = sphi %s997_s28, %s1194_s28   ;;  %s928_s27 = sphi %s995_s27, %s1193_s27  }
   0x5   : > { %s1020_s11 = sadd.s32 1, %s940_s30   ;;  %s212_s12 = sadd.s32 1, %s936_s29 }
   0x6   : > { %s209_s13 = ssub.s32 %s940_s30, %s1020_s11  ;;  %p222_p0 = scmp.ne.s32.totalorder %s936_s29, %s932_s28 }
   0x7   : > { %p210_p1 = scmp.eq.s32.totalorder %s209_s13, 0  ;;  %p223_p2 = scmp.eq.s32.totalorder %s1016_s9, 1 }
   0x8   : > { %p228_p3 = scmp.ne.s32.totalorder %s932_s28, %s928_s27  ;;  %p229_p4 = scmp.eq.s32.totalorder %s715_s10, 1 }
   0x9   : > { %s1031_s14 = scalar_select %p210_p1, %s936_s29, %s212_s12  }
   0xa   : > { %p1033_p5 = por %p223_p2, %p222_p0  ;;  %p1037_p6 = por %p229_p4, %p228_p3 }
   0xb   : > { %p716_p7 = scmp.ge.s32.totalorder %s940_s30, 1  ;;  %p236_p8 = scmp.lt.s32.totalorder %s940_s30, 3 }
   0xc   : > { %s1184_s15 = scalar_select %p1033_p5, 1, 0 }
   0xd   : > { %s1185_s16 = scalar_select %p1037_p6, 1, 0 }
   0xe   : > { %p1181_p9 = scmp.eq.s32.totalorder %s1016_s9, 0  ;;  %p1044_p10 = pnand %p716_p7, %p236_p8 }
   0xf   : > { %s942_s18 = smov [#allocation2]   ;;  %s846_s23 = scalar_lea.hbm %s1175_s3, 128 }
  0x10   : > { %s1186_s17 = scalar_select %p1044_p10, 1, 0 }
  0x11   : > { %s248_s19 = sshll.u32 %s942_s18, 4  ;;  %p777_p11 = pneg %p1044_p10  ;;  %s249_s19 = int_to_ptr.vmem [resolvable:$true] %s248_s19 }
  0x12   : > { %p847_p13 = scmp.ne.s32.totalorder %s1175_s3, %s846_s23  ;;  %p853_p3 = scmp.lt.u32.totalorder %s846_s23, %s1175_s3 }
  0x13   : > { %p1052_p12 = pnand %p1181_p9, %p777_p11 }
  0x15   : > { %p848_p0 = pneg %p1052_p12 }
  0x17   : > { %p849_p1 = pnand %p848_p0, %p847_p13 }
  0x19   : > { %p850_p2 = pneg %p849_p1 }
  0x1b   : > { %p855_p4 = pnand %p853_p3, %p850_p2 }
  0x1d   : > { %858 = shalt.err (!%p855_p4)
}
  0x1e   : > { %s859_s12 = scalar_lea.vmem %s249_s19, 128  ;;  %p867_p9 = scmp.lt.s32.totalorder %s249_s19, %s249_s19 }
  0x1f   : > { %p860_p7 = scmp.ne.s32.totalorder %s249_s19, %s859_s12  ;;  %p868_p6 = scmp.lt.s32.totalorder %s859_s12, %s859_s12 }
  0x21   : > { %p862_p8 = pnand %p860_p7, %p848_p0  ;;  %p869_p5 = por %p868_p6, %p867_p9 }
  0x23   : > { %p863_p11 = pneg %p862_p8 }
  0x25   : > { %p870_p10 = pnand %p869_p5, %p863_p11 }
  0x27   : > { %873 = shalt.err (!%p870_p10)
}
  0x28   : > { %s943_s13 = smov 64   ;;  %s944_s18 = smov 4  }
  0x29   : > { %780 = dma.hbm_to_vmem [thread:$0]  (!%p1052_p12), %s1175_s3, 128, %s249_s19, [#allocation3], %s943_s13, %s943_s13, %s944_s18  }
  0x2a   : > { %p1188_p13 = scmp.ne.s32.totalorder %s1186_s17, 0 }
  0x2b   : > { %p1189_p1 = scmp.eq.s32.totalorder (!%p1188_p13), %s1016_s9, 0 }
  0x2c   : > { %297 = sbr.rel (%p1188_p13) target bundleno = 1245 (0x4dd), region = 52 }
  0x33   : > { %919 = dma.done.wait (%p1189_p1), [#allocation3], 128   ;;  %p1190_p0 = pmov %p1189_p1 }
  0x34   : > { %p338_p5 = scmp.lt.s32.totalorder %s1016_s9, 1  ;;  %v945_v0 = vmov 0.0   ;;  %vm946_vm0 = vmmov 0   ;;  %v827_v1 = vld [vmem:[#allocation2] sm:$0xff]   ;;  %vm367_vm1 = vcmask 130048   ;;  %v829_v9 = vld [vmem:[%s1176_s4 + $0x8] sm:$0xff]  }
  0x35   : > { %921 = vsyncadd (%p1190_p0), [#allocation3], 4294967168  ;;  %749 = vmatprep.subr.bf16.mxu0 %v945_v0  ;;  %751 = vmatprep.mubr.msk.bf16.mxu0 %vm946_vm0, %v945_v0  ;;  %v828_v8 = vld [vmem:[%s1176_s4] sm:$0xff]   ;;  %vm442_vm3 = vcmask 261120   ;;  %v831_v24 = vld [vmem:[%s1178_s6 + $0x8] sm:$0xff]   ;;  %s947_s10 = smov 8  }
  0x36   : > { %s339_s20 = scalar_select %p338_p5, %s1016_s9, 1  ;;  %755 = vmatprep.subr.bf16.mxu1 %v945_v0  ;;  %759 = vmatprep.mubr.msk.bf16.mxu1 %vm946_vm0, %v945_v0  ;;  %v830_v23 = vld [vmem:[%s1178_s6] sm:$0xff]   ;;  %vm582_vm7 = vcmask 64512   ;;  %vm604_vm8 = vcmask 195584  }
  0x37   : > { %750 = vmatpush3.bf16.msra.mxu0 %v827_v1  ;;  %756 = vmatpush3.bf16.msra.mxu1 %v828_v8  ;;  %v728_v26 = vld [vmem:[%s1177_s5] ss:$0 sm:$0xff]  ;;  %s335_s22 = sand.u32 1, %s932_s28   ;;  %s738_s19 = sshll.u32 %s1016_s9, 7 }
  0x38   : > { %s1082_s17 = sshll.u32 %s339_s20, 3  ;;  %763 = vmatprep.subr.bf16.mxu0 %v945_v0  ;;  %757 = vmatprep.subr.bf16.mxu1 %v945_v0  ;;  %v733_v40 = vld [vmem:[%s1179_s7] ss:$0 sm:$0xff]  ;;  %s721_s20 = sshll.u32 %s335_s22, 3 }
  0x39   : > { %s341_s24 = scalar_lea.vmem %s1172_s0, %s1082_s17  ;;  %s345_s21 = scalar_lea.vmem %s1173_s1, %s1082_s17 }
  0x3a   : > { %v351_v2 = vld [vmem:[%s341_s24] sm:$0xff]  ;;  %s349_s26 = scalar_lea.vmem %s1174_s2, %s1082_s17  ;;  %s337_s23 = scalar_lea.vmem [#allocation5], %s721_s20 }
  0x3b   : > { %v352_v3 = vadd.f32 1.0, %v351_v2  ;;  %758 = vmatpush3.bf16.msra.mxu1 %v829_v9  ;;  %v360_v10 = vld [vmem:[%s345_s21] sm:$0xff]  ;;  %s948_s21 = smov 120   ;;  %s620_s24 = sshll.u32 %s337_s23, 4  ;;  %s1131_s24 = int_to_ptr.vmem [resolvable:$true] %s620_s24 }
  0x3c   : > { %v571_v25 = vld [vmem:[%s349_s26] sm:$0xff]  ;;  %s1129_s12 = scalar_lea.hbm %s1180_s8, %s738_s19  ;;  %s607_s9 = scalar_lea.sflag [#allocation4], %s335_s22 }
  0x3d   : > { %832 = vlog2.f32 %v352_v3  ;;  %573 = vrot.lane.b32.xlu0 %v571_v25, %s947_s10  ;;  %p1191_p9 = scmp.ne.s32.totalorder %s1184_s15, 0  ;;  %s949_s13 = smov [#allocation5]  }
  0x3e   : > { %s878_s17 = sshll.u32 %s949_s13, 4  ;;  %s879_s17 = int_to_ptr.vmem [resolvable:$false] %s878_s17 }
  0x3f   : > { %s880_s18 = scalar_lea.vmem %s879_s17, 256  ;;  %p881_p2 = scmp.lt.s32.totalorder %s1131_s24, %s879_s17 }
  0x47   : > { %v833_v4 = vpop.eup %832 }
  0x48   : > { %v354_v5 = vmul.f32 0.6931472, %v833_v4 }
  0x4a   : > { %v356_v6 = vmul.f32 1.442695, %v354_v5 }
  0x4c   : > { %v357_v7 = vpack.c.bf16 %v356_v6, %v356_v6 }
  0x4e   : > { %752 = vmatmul.mubr.msk.bf16.vlgmr.msra.gmra.mrb[0].mxu0 %vm367_vm1, %v357_v7 }
  0x4f   : > { %767 = vmatprep.mubr.msk.bf16.mxu0 %vm946_vm0, %v945_v0  ;;  %764 = vmatpush3.bf16.msra.mxu0 %v830_v23 }
  0x50   : > { %765 = vmatprep.subr.bf16.mxu0 %v945_v0 }
  0x53   : > { %766 = vmatpush3.bf16.msra.mxu0 %v831_v24 }
  0xaf   : > { %v574_v51 = vpop.permute.xlu0 %573 }
 0x121   : > { %v405_v11 = vpop.f32.mrb[0].mxu0 }
 0x122   : > { %v406_v12 = vadd.f32 %v405_v11, %v360_v10  ;;  %v753_v13 = vpop.f32.mrb[1].mxu0 }
 0x123   : > { %v408_v14 = vpop.f32.mrb[2].mxu0 }
 0x124   : > { %v412_v15 = vmul.f32 1.442695, %v406_v12  ;;  %v754_v16 = vpop.f32.mrb[3].mxu0  ;;  %vm411_vm2 = vcmp.gt.f32.partialorder %v406_v12, 0.0 }
 0x126   : > { %834 = vpow2.f32 %v412_v15 }
 0x130   : > { %v835_v17 = vpop.eup %834 }
 0x131   : > { %v727_v18 = vadd.f32 -1.0, %v835_v17 }
 0x133   : > { %v415_v19 = vmul.f32 1.6732632, %v727_v18 }
 0x135   : > { %v416_v20 = vsel %vm411_vm2, %v406_v12, %v415_v19 }
 0x136   : > { %v417_v21 = vmul.f32 1.050701, %v416_v20 }
 0x138   : > { %v418_v22 = vpack.c.bf16 %v417_v21, %v417_v21 }
 0x13a   : > { %760 = vmatmul.mubr.msk.bf16.vlgmr.msra.gmra.mrb[0].mxu1 %vm442_vm3, %v418_v22 }
 0x20d   : > { %v480_v27 = vpop.f32.mrb[0].mxu1 }
 0x20e   : > { %v481_v28 = vadd.f32 %v728_v26, %v480_v27  ;;  %v761_v29 = vpop.f32.mrb[1].mxu1 }
 0x20f   : > { %v483_v30 = vpop.f32.mrb[2].mxu1 }
 0x210   : > { %v487_v31 = vmul.f32 1.442695, %v481_v28  ;;  %v762_v32 = vpop.f32.mrb[3].mxu1  ;;  %vm486_vm4 = vcmp.gt.f32.partialorder %v481_v28, 0.0 }
 0x212   : > { %836 = vpow2.f32 %v487_v31 }
 0x21c   : > { %v837_v33 = vpop.eup %836 }
 0x21d   : > { %v732_v34 = vadd.f32 -1.0, %v837_v33 }
 0x21f   : > { %v490_v35 = vmul.f32 1.6732632, %v732_v34 }
 0x221   : > { %v491_v36 = vsel %vm486_vm4, %v481_v28, %v490_v35 }
 0x222   : > { %v492_v37 = vmul.f32 1.050701, %v491_v36 }
 0x224   : > { %v493_v38 = vmin.f32 %v492_v37, 10000000.0 }
 0x226   : > { %v494_v39 = vpack.c.bf16 %v493_v38, %v493_v38 }
 0x228   : > { %768 = vmatmul.mubr.msk.bf16.vlgmr.msra.gmra.mrb[4].mxu0 %vm442_vm3, %v494_v39 }
 0x2fb   : > { %v555_v41 = vpop.f32.mrb[4].mxu0 }
 0x2fc   : > { %v556_v42 = vadd.f32 %v733_v40, %v555_v41  ;;  %v769_v43 = vpop.f32.mrb[5].mxu0 }
 0x2fd   : > { %v558_v44 = vpop.f32.mrb[6].mxu0 }
 0x2fe   : > { %v561_v45 = vmul.f32 1.442695, %v556_v42  ;;  %v770_v46 = vpop.f32.mrb[7].mxu0 }
 0x300   : > { %838 = vpow2.f32 %v561_v45 }
 0x30a   : > { %v839_v47 = vpop.eup %838 }
 0x30b   : > { %v563_v48 = vadd.f32 0.0001, %v839_v47 }
 0x30d   : > { %840 = vrsqrt.f32 %v563_v48  ;;  %vm566_vm5 = vcmp.eq.f32.partialorder %v563_v48, inf  ;;  %v569_v52 = vand.u32 2147483648, %v563_v48  ;;  %vm568_vm6 = vcmp.eq.f32.partialorder %v563_v48, 0.0 }
 0x317   : > { %v841_v49 = vpop.eup %840 }
 0x318   : > { %v565_v50 = vmul.f32 %v841_v49, %v563_v48 }
 0x31a   : > { %v567_v53 = vsel %vm566_vm5, %v563_v48, %v565_v50 }
 0x31b   : > { %v570_v54 = vsel %vm568_vm6, %v569_v52, %v567_v53 }
 0x31c   : > { %v576_v55 = vmul.f32 %v574_v51, %v570_v54 }
 0x31e   : > { %578 = vrot.lane.b32.xlu0 %v576_v55, %s948_s21 }
 0x322   : > { %595 = vrot.lane.b32.xlu0 %v556_v42, %s947_s10 }
 0x390   : > { %v579_v56 = vpop.permute.xlu0 %578 }
 0x391   : > { %v581_v57 = vadd.f32 %v579_v56, %v556_v42 }
 0x393   : > { %v583_v58 = vsel %vm582_vm7, %v581_v57, -inf }
 0x394   : > { %584 = vmax.xlane.f32.xlu1 %v583_v58  ;;  %v596_v3 = vpop.permute.xlu0 %595 }
 0x421   : > { %v585_v59 = vpop.xlane.xlu1 %584 }
 0x422   : > { %v586_v60 = vsub.f32 %v581_v57, %v585_v59 }
 0x424   : > { %v587_v61 = vmul.f32 1.442695, %v586_v60 }
 0x426   : > { %842 = vpow2.f32 %v587_v61 }
 0x430   : > { %v843_v62 = vpop.eup %842 }
 0x431   : > { %v589_v63 = vsel %vm582_vm7, %v843_v62, 0.0 }
 0x432   : > { %590 = vadd.xlane.f32.xlu1 %v589_v63 }
 0x443   : > { %599 = vrot.lane.b32.xlu1 %v563_v48, %s947_s10  ;;  %s874_s10 = scalar_lea.vmem %s1131_s24, 128 }
 0x444   : > { %p875_p6 = scmp.ne.s32.totalorder %s1131_s24, %s874_s10  ;;  %p882_p3 = scmp.lt.s32.totalorder %s880_s18, %s874_s10 }
 0x446   : > { %p876_p10 = pnand %p875_p6, %p1191_p9  ;;  %p883_p4 = por %p882_p3, %p881_p2 }
 0x448   : > { %p877_p12 = pneg %p876_p10 }
 0x44a   : > { %p884_p7 = pnand %p883_p4, %p877_p12 }
 0x4bf   : > { %v591_v0 = vpop.xlane.xlu1 %590 }
 0x4c0   : > { %844 = vrcp.f32 %v591_v0 }
 0x4c3   : > { %v600_v4 = vpop.permute.xlu1 %599 }
 0x4ca   : > { %v845_v1 = vpop.eup %844 }
 0x4cb   : > { %v593_v2 = vmul.f32 %v845_v1, %v843_v62 }
 0x4cd   : > { %v602_v5 = vsel %vm582_vm7, %v593_v2, %v596_v3 }
 0x4ce   : > { %v603_v6 = vsel %vm367_vm1, %v602_v5, %v600_v4 }
 0x4cf   : > { %605 = vst.msk [vmem:[%s337_s23] sm:$0xff] %vm604_vm8, %v603_v6 }
 0x4d0   : > { %887 = shalt.err (!%p884_p7)
}
 0x4d1   : > { %s888_s21 = scalar_lea.hbm %s1129_s12, 128  ;;  %s892_s19 = scalar_lea.hbm %s1180_s8, 256 }
 0x4d2   : > { %p889_p8 = scmp.ne.s32.totalorder %s1129_s12, %s888_s21  ;;  %p893_p1 = scmp.lt.u32.totalorder %s1129_s12, %s1180_s8 }
 0x4d3   : > { %p894_p0 = scmp.lt.u32.totalorder %s892_s19, %s888_s21  ;;  %p896_p6 = scmp.lt.u32.totalorder %s888_s21, %s1129_s12 }
 0x4d4   : > { %p890_p11 = pnand %p889_p8, %p1191_p9 }
 0x4d5   : > { %p895_p5 = por %p894_p0, %p893_p1 }
 0x4d6   : > { %p891_p13 = pneg %p890_p11 }
 0x4d7   : > { %p897_p10 = por %p896_p6, %p895_p5 }
 0x4d9   : > { %p898_p12 = pnand %p897_p10, %p891_p13 }
 0x4db   : > { %901 = shalt.err (!%p898_p12)
}
 0x4dc   : > { %775 = dma.vmem_to_hbm [thread:$0]  (%p1191_p9), %s1131_s24, 128, %s1129_s12, %s607_s9  }
 0x4dd PF: > { %p787_p2 = scmp.ge.s32.totalorder %s940_s30, 2  ;;  %s632_s26 = sand.u32 1, %s928_s27  }
 0x4de   : > { %p1192_p3 = scmp.ne.s32.totalorder %s1185_s16, 0  ;;  %s633_s10 = scalar_lea.sflag [#allocation4], %s632_s26 }
 0x4e0   : > { %p782_p4 = pnand %p787_p2, %p1192_p3 }
 0x4e2   : > { %923 = dma.done.wait (!%p782_p4), %s633_s10, 128  }
 0x4e3   : > { %925 = vsyncadd (!%p782_p4), %s633_s10, 4294967168  ;;  %p19_p7 = scmp.ge.s32.totalorder %s1020_s11, 4   ;;  %s1193_s27 = smov %s932_s28 }
 0x4e4   : > { %s1194_s28 = smov %s936_s29  ;;  %s1195_s29 = smov %s1031_s14 }
 0x4e5   : > { %s1196_s30 = smov %s1020_s11  ;;  %21 = sbr.rel (!%p19_p7) target bundleno = 4 (0x4), region = 98 }
 0x4ec   :  { %638 = vsyncpa [#allocation3], 1 }
 0x4ed   :  { %640 = vsyncpa [#allocation3 + $0x1], 1 }
 0x4ee   :  { %641 = vsyncpa [#allocation4], 1 }
 0x4ef   :  { %643 = vsyncpa [#allocation4 + $0x1], 1 }

</bundles_post_ra>
